<compile_context>
chip_gen: v7x
topology: tpu7x:2x2x1
jax: 0.10.0
libtpu: 0.0.40
codegen_flags: <defaults>
</compile_context>

<pallas_src>
import jax
import jax.numpy as jnp
from jax import lax
from jax.experimental import pallas as pl
from jax.experimental.pallas import tpu as pltpu

LANES = 128      # lane (minor) dimension
SUBLANES = 8     # f32 sublane tile
CHUNK_ROWS = 512  # in-kernel compute granularity (256 KiB f32 temporaries)
# pl.reciprocal(approx=True) moves the sigmoid divide to the EUP (helps the
# VALU-bound v7x regime) at ~1e-3 relative error; keep exact by default so the
# loss matches the reference to 1e-5.
APPROX_RECIPROCAL = False


def _default_max_block_rows() -> int:
    """Largest input block (rows of 128 lanes) safe under default scoped VMEM."""
    try:
        kind = jax.devices()[0].device_kind.lower()
    except Exception:
        return 4096
    if "v6" in kind or "v7" in kind or "7x" in kind:
        return 8192   # 4 MiB/input/buffer -> 16 MiB double-buffered < 32 MiB scoped
    return 4096       # v5e (16 MiB default scoped VMEM) and unknown chips


def _partial_sums(x, y):
    """f32 (n, 128) chunk -> four (8, 128) partial-sum bands (n % 8 == 0)."""
    n = x.shape[0]
    # One exponential shared between BCE and sigmoid.
    e = jnp.exp(-jnp.abs(x))
    # Numerically-stable BCE with logits: max(x,0) - x*y + log1p(exp(-|x|)).
    bce = jnp.maximum(x, 0.0) - x * y + jnp.log1p(e)
    inv = pl.reciprocal(1.0 + e, approx=APPROX_RECIPROCAL)
    s = jnp.where(x >= 0.0, inv, e * inv)   # == sigmoid(x), branch-free

    def band(q):
        # Sublane-preserving reduction: pure VPU adds, no XLU collapse.
        return q.reshape(n // SUBLANES, SUBLANES, LANES).sum(axis=0)

    return band(bce), band(s), band(y), band(s * y)


def _reduce_rows(x_ref, y_ref, nrows):
    """Partial sums over rows [0, nrows) of the current block (static, % 8 == 0)."""
    zero = jnp.zeros((SUBLANES, LANES), jnp.float32)
    acc = (zero, zero, zero, zero)

    def chunk(start, n, acc):
        xs = x_ref[pl.ds(start, n), :].astype(jnp.float32)
        ys = y_ref[pl.ds(start, n), :].astype(jnp.float32)
        p = _partial_sums(xs, ys)
        return tuple(a + b for a, b in zip(acc, p))

    full = nrows // CHUNK_ROWS
    rem = nrows % CHUNK_ROWS
    if full > 0:
        def body(j, carry):
            start = pl.multiple_of(j * CHUNK_ROWS, CHUNK_ROWS)
            return chunk(start, CHUNK_ROWS, carry)
        acc = lax.fori_loop(0, full, body, acc, unroll=True)
    if rem:
        acc = chunk(full * CHUNK_ROWS, rem, acc)
    return acc


def _write(out_ref, acc):
    out_ref[0] = acc[0]   # sum bce
    out_ref[1] = acc[1]   # sum sigmoid
    out_ref[2] = acc[2]   # sum target
    out_ref[3] = acc[3]   # sum sigmoid*target


def _make_kernel(num_blocks, block_rows, last_rows):
    """Kernel writing one (4, 8, 128) partial-sum block per grid step."""
    def kernel(x_ref, y_ref, out_ref):
        if num_blocks == 1 or last_rows == block_rows:
            # All blocks are full: single mask-free path.
            _write(out_ref, _reduce_rows(x_ref, y_ref, block_rows))
        else:
            # Only the final block is ragged; its valid-row count is static, so
            # the hot (non-last) path stays completely mask-free.
            is_last = pl.program_id(0) == num_blocks - 1

            @pl.when(jnp.logical_not(is_last))
            def _():
                _write(out_ref, _reduce_rows(x_ref, y_ref, block_rows))

            @pl.when(is_last)
            def _():
                _write(out_ref, _reduce_rows(x_ref, y_ref, last_rows))

    return kernel


def dice_bce_loss(inputs: jax.Array, targets: jax.Array, smooth: float = 1.0,
                  *, max_block_rows: int | None = None) -> jax.Array:
    """Equivalent of the PyTorch DiceBCELoss.forward (returns a scalar)."""
    assert inputs.shape == targets.shape
    total_n = int(inputs.size)

    x_flat = inputs.reshape(-1)        # bitcast, no copy
    y_flat = targets.reshape(-1)
    if y_flat.dtype == jnp.bool_:
        # bool (i1) tiles are awkward on TPU; int8 is still 1 B/elem.
        y_flat = y_flat.astype(jnp.int8)

    if max_block_rows is None:
        max_block_rows = _default_max_block_rows()

    n_rows = total_n // LANES
    kernel_rows = (n_rows // SUBLANES) * SUBLANES   # rows handled by the kernel
    kernel_elems = kernel_rows * LANES

    bce_sum = jnp.float32(0.0)
    sig_sum = jnp.float32(0.0)
    tgt_sum = jnp.float32(0.0)
    inter_sum = jnp.float32(0.0)

    if kernel_rows > 0:
        if kernel_elems == total_n:
            x2 = x_flat.reshape(kernel_rows, LANES)   # pure bitcast
            y2 = y_flat.reshape(kernel_rows, LANES)
        else:
            # Rare edge case (size % 1024 != 0): the prefix slice materializes
            # one copy.  Typical segmentation shapes never hit this.
            x2 = x_flat[:kernel_elems].reshape(kernel_rows, LANES)
            y2 = y_flat[:kernel_elems].reshape(kernel_rows, LANES)

        block_rows = min(kernel_rows, max_block_rows)
        num_blocks = pl.cdiv(kernel_rows, block_rows)
        last_rows = kernel_rows - (num_blocks - 1) * block_rows

        parts = pl.pallas_call(
            _make_kernel(num_blocks, block_rows, last_rows),
            out_shape=jax.ShapeDtypeStruct((num_blocks, 4, SUBLANES, LANES),
                                           jnp.float32),
            grid_spec=pltpu.PrefetchScalarGridSpec(
                num_scalar_prefetch=0,
                grid=(num_blocks,),
                in_specs=[
                    pl.BlockSpec((block_rows, LANES), lambda i: (i, 0)),
                    pl.BlockSpec((block_rows, LANES), lambda i: (i, 0)),
                ],
                # One independent partial-sum block per grid step -> the grid
                # axis is truly parallel (sharded across v7x's 2 TensorCores).
                out_specs=pl.BlockSpec((None, 4, SUBLANES, LANES),
                                       lambda i: (i, 0, 0, 0)),
            ),
            compiler_params=pltpu.CompilerParams(
                dimension_semantics=("parallel",),
            ),
        )(x2, y2)

        sums = jnp.sum(parts, axis=(0, 2, 3))   # tiny final collapse in plain JAX
        bce_sum, sig_sum, tgt_sum, inter_sum = sums[0], sums[1], sums[2], sums[3]

    # Remainder not covered by the kernel (< 1024 elements): plain jnp.
    if total_n - kernel_elems:
        xt = x_flat[kernel_elems:].astype(jnp.float32)
        yt = y_flat[kernel_elems:].astype(jnp.float32)
        et = jnp.exp(-jnp.abs(xt))
        bce_sum = bce_sum + jnp.sum(jnp.maximum(xt, 0.0) - xt * yt + jnp.log1p(et))
        st = jax.nn.sigmoid(xt)
        sig_sum = sig_sum + jnp.sum(st)
        tgt_sum = tgt_sum + jnp.sum(yt)
        inter_sum = inter_sum + jnp.sum(st * yt)

    bce_loss = bce_sum / total_n
    dice_loss = 1.0 - (2.0 * inter_sum + smooth) / (sig_sum + tgt_sum + smooth)
    return bce_loss + dice_loss


def _reference(inputs, targets, smooth=1.0):
    x = inputs.astype(jnp.float32)
    y = targets.astype(jnp.float32)
    bce = jnp.mean(jnp.maximum(x, 0.0) - x * y + jnp.log1p(jnp.exp(-jnp.abs(x))))
    s = jax.nn.sigmoid(x).reshape(-1)
    yf = y.reshape(-1)
    inter = jnp.sum(s * yf)
    dice = 1.0 - (2.0 * inter + smooth) / (jnp.sum(s) + jnp.sum(yf) + smooth)
    return bce + dice


if __name__ == "__main__":
    key = jax.random.PRNGKey(0)
    k1, k2, k3, k4 = jax.random.split(key, 4)

    # NCHW, matching the PyTorch convention for segmentation logits/targets.
    inputs = jax.random.normal(k1, (2, 4, 16, 16), dtype=jnp.float32)
    targets = (jax.random.uniform(k2, (2, 4, 16, 16)) > 0.5).astype(jnp.float32)

    out = jax.jit(dice_bce_loss)(inputs, targets)
    out = jax.block_until_ready(out)
    ref = _reference(inputs, targets, 1.0)
    assert jnp.allclose(out, ref, atol=1e-5, rtol=1e-5), (out, ref)

    # Also exercise the multi-block / ragged-last-block / jnp-tail paths with a
    # small forced block size (40 rows -> kernel 24 rows in 16+8, 128-elem tail).
    inputs2 = jax.random.normal(k3, (2, 4, 20, 20), dtype=jnp.float32)
    targets2 = (jax.random.uniform(k4, (2, 4, 20, 20)) > 0.5).astype(jnp.float32)
    out2 = dice_bce_loss(inputs2, targets2, max_block_rows=16)
    out2 = jax.block_until_ready(out2)
    ref2 = _reference(inputs2, targets2, 1.0)
    assert jnp.allclose(out2, ref2, atol=1e-5, rtol=1e-5), (out2, ref2)

    print("KERNEL_OK")
</pallas_src>

<mosaic_0001>
module attributes {stable_mosaic.version = 11 : i64} {
  func.func @kernel(%arg0: i32, %arg1: memref<16x128xf32, #tpu.memory_space<vmem>>, %arg2: memref<16x128xf32, #tpu.memory_space<vmem>>, %arg3: memref<1x4x8x128xf32, #tpu.memory_space<vmem>>) attributes {dimension_semantics = [#tpu.dimension_semantics<parallel>], iteration_bounds = array<i64: 1>, scalar_prefetch = 0 : i64, scratch_operands = 0 : i64, tpu.core_type = #tpu.core_type<tc>, window_params = [{transform_indices = @transform_0, window_bounds = array<i64: 16, 128>}, {transform_indices = @transform_1, window_bounds = array<i64: 16, 128>}, {transform_indices = @transform_2, window_bounds = array<i64: 1, 4, 8, 128>}]} {
    %cst = arith.constant 0.000000e+00 : f32
    %0 = vector.broadcast %cst : f32 to vector<8x128xf32>
    %c0 = arith.constant 0 : index
    %c0_0 = arith.constant 0 : index
    %1 = vector.load %arg1[%c0, %c0_0] : memref<16x128xf32, #tpu.memory_space<vmem>>, vector<16x128xf32>
    %c0_1 = arith.constant 0 : index
    %c0_2 = arith.constant 0 : index
    %2 = vector.load %arg2[%c0_1, %c0_2] : memref<16x128xf32, #tpu.memory_space<vmem>>, vector<16x128xf32>
    %3 = math.absf %1 : vector<16x128xf32>
    %cst_3 = arith.constant 0.000000e+00 : f32
    %4 = vector.broadcast %cst_3 : f32 to vector<16x128xf32>
    %5 = arith.subf %4, %3 : vector<16x128xf32>
    %6 = math.exp %5 : vector<16x128xf32>
    %cst_4 = arith.constant 0.000000e+00 : f32
    %7 = vector.broadcast %cst_4 : f32 to vector<16x128xf32>
    %8 = arith.maximumf %1, %7 : vector<16x128xf32>
    %9 = arith.mulf %1, %2 : vector<16x128xf32>
    %10 = arith.subf %8, %9 : vector<16x128xf32>
    %11 = math.log1p %6 : vector<16x128xf32>
    %12 = arith.addf %10, %11 : vector<16x128xf32>
    %cst_5 = arith.constant 1.000000e+00 : f32
    %13 = vector.broadcast %cst_5 : f32 to vector<16x128xf32>
    %14 = arith.addf %13, %6 : vector<16x128xf32>
    %15 = tpu.reciprocal %14 : vector<16x128xf32> -> vector<16x128xf32>
    %cst_6 = arith.constant 0.000000e+00 : f32
    %16 = vector.broadcast %cst_6 : f32 to vector<16x128xf32>
    %17 = arith.cmpf oge, %1, %16 : vector<16x128xf32>
    %18 = arith.mulf %6, %15 : vector<16x128xf32>
    %19 = arith.select %17, %15, %18 : vector<16x128xi1>, vector<16x128xf32>
    %20 = vector.shape_cast %12 : vector<16x128xf32> to vector<2x8x128xf32>
    %cst_7 = arith.constant dense<0.000000e+00> : vector<8x128xf32>
    %21 = vector.multi_reduction <add>, %20, %cst_7 [0] : vector<2x8x128xf32> to vector<8x128xf32>
    %22 = vector.shape_cast %19 : vector<16x128xf32> to vector<2x8x128xf32>
    %cst_8 = arith.constant dense<0.000000e+00> : vector<8x128xf32>
    %23 = vector.multi_reduction <add>, %22, %cst_8 [0] : vector<2x8x128xf32> to vector<8x128xf32>
    %24 = vector.shape_cast %2 : vector<16x128xf32> to vector<2x8x128xf32>
    %cst_9 = arith.constant dense<0.000000e+00> : vector<8x128xf32>
    %25 = vector.multi_reduction <add>, %24, %cst_9 [0] : vector<2x8x128xf32> to vector<8x128xf32>
    %26 = arith.mulf %19, %2 : vector<16x128xf32>
    %27 = vector.shape_cast %26 : vector<16x128xf32> to vector<2x8x128xf32>
    %cst_10 = arith.constant dense<0.000000e+00> : vector<8x128xf32>
    %28 = vector.multi_reduction <add>, %27, %cst_10 [0] : vector<2x8x128xf32> to vector<8x128xf32>
    %29 = arith.addf %0, %21 : vector<8x128xf32>
    %30 = arith.addf %0, %23 : vector<8x128xf32>
    %31 = arith.addf %0, %25 : vector<8x128xf32>
    %32 = arith.addf %0, %28 : vector<8x128xf32>
    %c0_11 = arith.constant 0 : index
    %c0_12 = arith.constant 0 : index
    %c0_13 = arith.constant 0 : index
    %c0_14 = arith.constant 0 : index
    %33 = vector.load %arg3[%c0_11, %c0_12, %c0_13, %c0_14] : memref<1x4x8x128xf32, #tpu.memory_space<vmem>>, vector<1x1x8x128xf32>
    %34 = vector.shape_cast %33 : vector<1x1x8x128xf32> to vector<8x128xf32>
    %35 = vector.shape_cast %29 : vector<8x128xf32> to vector<1x1x8x128xf32>
    tpu.vector_store %arg3[%c0_11, %c0_12, %c0_13, %c0_14], %35 {strides = array<i32>} : memref<1x4x8x128xf32, #tpu.memory_space<vmem>>, vector<1x1x8x128xf32>,
    %c0_15 = arith.constant 0 : index
    %c1 = arith.constant 1 : index
    %c0_16 = arith.constant 0 : index
    %c0_17 = arith.constant 0 : index
    %36 = vector.load %arg3[%c0_15, %c1, %c0_16, %c0_17] : memref<1x4x8x128xf32, #tpu.memory_space<vmem>>, vector<1x1x8x128xf32>
    %37 = vector.shape_cast %36 : vector<1x1x8x128xf32> to vector<8x128xf32>
    %38 = vector.shape_cast %30 : vector<8x128xf32> to vector<1x1x8x128xf32>
    tpu.vector_store %arg3[%c0_15, %c1, %c0_16, %c0_17], %38 {strides = array<i32>} : memref<1x4x8x128xf32, #tpu.memory_space<vmem>>, vector<1x1x8x128xf32>,
    %c0_18 = arith.constant 0 : index
    %c2 = arith.constant 2 : index
    %c0_19 = arith.constant 0 : index
    %c0_20 = arith.constant 0 : index
    %39 = vector.load %arg3[%c0_18, %c2, %c0_19, %c0_20] : memref<1x4x8x128xf32, #tpu.memory_space<vmem>>, vector<1x1x8x128xf32>
    %40 = vector.shape_cast %39 : vector<1x1x8x128xf32> to vector<8x128xf32>
    %41 = vector.shape_cast %31 : vector<8x128xf32> to vector<1x1x8x128xf32>
    tpu.vector_store %arg3[%c0_18, %c2, %c0_19, %c0_20], %41 {strides = array<i32>} : memref<1x4x8x128xf32, #tpu.memory_space<vmem>>, vector<1x1x8x128xf32>,
    %c0_21 = arith.constant 0 : index
    %c3 = arith.constant 3 : index
    %c0_22 = arith.constant 0 : index
    %c0_23 = arith.constant 0 : index
    %42 = vector.load %arg3[%c0_21, %c3, %c0_22, %c0_23] : memref<1x4x8x128xf32, #tpu.memory_space<vmem>>, vector<1x1x8x128xf32>
    %43 = vector.shape_cast %42 : vector<1x1x8x128xf32> to vector<8x128xf32>
    %44 = vector.shape_cast %32 : vector<8x128xf32> to vector<1x1x8x128xf32>
    tpu.vector_store %arg3[%c0_21, %c3, %c0_22, %c0_23], %44 {strides = array<i32>} : memref<1x4x8x128xf32, #tpu.memory_space<vmem>>, vector<1x1x8x128xf32>,
    return
  }
  func.func @transform_0(%arg0: i32) -> (i32, i32) {
    %c0_i32 = arith.constant 0 : i32
    %c0_i32_0 = arith.constant 0 : i32
    return %arg0, %c0_i32 : i32, i32
  }
  func.func @transform_1(%arg0: i32) -> (i32, i32) {
    %c0_i32 = arith.constant 0 : i32
    %c0_i32_0 = arith.constant 0 : i32
    return %arg0, %c0_i32 : i32, i32
  }
  func.func @transform_2(%arg0: i32) -> (i32, i32, i32, i32) {
    %c0_i32 = arith.constant 0 : i32
    %c0_i32_0 = arith.constant 0 : i32
    %c0_i32_1 = arith.constant 0 : i32
    %c0_i32_2 = arith.constant 0 : i32
    return %arg0, %c0_i32, %c0_i32_0, %c0_i32_1 : i32, i32, i32, i32
  }
}

</mosaic_0001>

<bundles_post_ra>
// kernel: dice_bce_loss.1
= control target key start
LH: loop header
LB: loop body
LE: loop exit
PB: predicated region body
PF: predicated region fallthrough
CT: control target
= control target key end

     0   :  { %s134_s0 = inlined_call_operand.vmem [shape: f32[16,128], index: 0, kind: input, shape index: {}]   ;;  %s135_s1 = inlined_call_operand.vmem [shape: f32[16,128], index: 1, kind: input, shape index: {}]   ;;  %s136_s2 = inlined_call_operand.vmem [shape: f32[1,4,8,128], index: 2, kind: output, shape index: {}]  }
   0x1   :  { %v11_v0 = vld [vmem:[%s134_s0] sm:$0xff]  ;;  %v12_v1 = vld [vmem:[%s134_s0 + $0x8] sm:$0xff] }
   0x2   :  { %v15_v2 = vand.u32 2147483647, %v11_v0  ;;  %v16_v3 = vand.u32 2147483647, %v12_v1  ;;  %v13_v4 = vld [vmem:[%s135_s1] sm:$0xff]  ;;  %v14_v5 = vld [vmem:[%s135_s1 + $0x8] sm:$0xff] }
   0x3   :  { %v61_v8 = vadd.f32 %v14_v5, %v13_v4  ;;  %v23_v18 = vmax.f32 %v11_v0, 0.0  ;;  %v25_v19 = vmul.f32 %v13_v4, %v11_v0  ;;  %v24_v22 = vmax.f32 %v12_v1, 0.0 }
   0x4   :  { %v17_v6 = vsub.f32 0.0, %v15_v2  ;;  %v18_v7 = vsub.f32 0.0, %v16_v3  ;;  %v26_v23 = vmul.f32 %v14_v5, %v12_v1  ;;  %vm53_vm2 = vcmp.ge.f32.partialorder %v11_v0, 0.0 }
   0x5   :  { %81 = vst [vmem:[%s136_s2 + $0x10] sm:$0xff] %v61_v8  ;;  %v27_v27 = vsub.f32 %v23_v18, %v25_v19  ;;  %vm54_vm3 = vcmp.ge.f32.partialorder %v12_v1, 0.0 }
   0x6   :  { %v19_v9 = vmul.f32 1.442695, %v17_v6  ;;  %v21_v10 = vmul.f32 1.442695, %v18_v7  ;;  %v28_v30 = vsub.f32 %v24_v22, %v26_v23 }
   0x8   :  { %83 = vpow2.f32 %v19_v9 }
   0x9   :  { %85 = vpow2.f32 %v21_v10 }
  0x12   :  { %v84_v11 = vpop.eup %83 }
  0x13   :  { %v86_v12 = vpop.eup %85  ;;  %v29_v13 = vadd.f32 1.0, %v84_v11  ;;  %v32_v15 = vmul.f32 -0.5, %v84_v11  ;;  %v35_v20 = vand.u32 2147483647, %v84_v11 }
  0x14   :  { %v38_v14 = vadd.f32 1.0, %v86_v12  ;;  %v41_v16 = vmul.f32 -0.5, %v86_v12  ;;  %v44_v24 = vand.u32 2147483647, %v86_v12 }
  0x15   :  { %87 = vlog2.f32 %v29_v13  ;;  %v33_v17 = vadd.f32 1.0, %v32_v15  ;;  %vm36_vm0 = vcmp.lt.f32.partialorder %v35_v20, 0.0004427343 }
  0x16   :  { %89 = vlog2.f32 %v38_v14  ;;  %v42_v21 = vadd.f32 1.0, %v41_v16  ;;  %vm45_vm1 = vcmp.lt.f32.partialorder %v44_v24, 0.0004427343 }
  0x17   :  { %91 = vrcp.f32 %v29_v13  ;;  %v34_v25 = vmul.f32 %v84_v11, %v33_v17 }
  0x18   :  { %93 = vrcp.f32 %v38_v14  ;;  %v43_v28 = vmul.f32 %v86_v12, %v42_v21 }
  0x1f   :  { %v88_v26 = vpop.eup %87 }
  0x20   :  { %v90_v29 = vpop.eup %89  ;;  %v31_v31 = vmul.f32 0.6931472, %v88_v26 }
  0x21   :  { %v92_v32 = vpop.eup %91  ;;  %v40_v33 = vmul.f32 0.6931472, %v90_v29 }
  0x22   :  { %v94_v34 = vpop.eup %93  ;;  %v37_v35 = vsel %vm36_vm0, %v34_v25, %v31_v31  ;;  %v55_v36 = vmul.f32 %v92_v32, %v84_v11 }
  0x23   :  { %v46_v37 = vsel %vm45_vm1, %v43_v28, %v40_v33  ;;  %v47_v38 = vadd.f32 %v37_v35, %v27_v27  ;;  %v56_v39 = vmul.f32 %v94_v34, %v86_v12 }
  0x24   :  { %v48_v40 = vadd.f32 %v46_v37, %v28_v30  ;;  %v57_v41 = vsel %vm53_vm2, %v92_v32, %v55_v36 }
  0x25   :  { %v58_v42 = vsel %vm54_vm3, %v94_v34, %v56_v39  ;;  %v62_v43 = vmul.f32 %v57_v41, %v13_v4 }
  0x26   :  { %v59_v44 = vadd.f32 %v48_v40, %v47_v38  ;;  %v60_v45 = vadd.f32 %v58_v42, %v57_v41  ;;  %v63_v46 = vmul.f32 %v58_v42, %v14_v5 }
  0x28   :  { %69 = vst [vmem:[%s136_s2] sm:$0xff] %v59_v44  ;;  %80 = vst [vmem:[%s136_s2 + $0x8] sm:$0xff] %v60_v45  ;;  %v64_v47 = vadd.f32 %v63_v46, %v62_v43 }
  0x2a   :  { %82 = vst [vmem:[%s136_s2 + $0x18] sm:$0xff] %v64_v47 }

</bundles_post_ra>
